<compile_context>
chip_gen: v7x
topology: tpu7x:2x2x1
jax: 0.10.0
libtpu: 0.0.40
codegen_flags: <defaults>
</compile_context>

<pallas_src>
import jax
import jax.numpy as jnp
from jax import lax
from jax.experimental import pallas as pl
from jax.experimental.pallas import tpu as pltpu
import numpy as np


def _softplus(x):
    # Thresholded softplus: numerically equivalent to F.softplus for f32,
    # one exp + one log1p per element (vs. logaddexp's max/exp/log1p chain).
    safe = jnp.minimum(x, 20.0)
    return jnp.where(x > 20.0, x, jnp.log1p(jnp.exp(safe)))


def _bayes_linear_sample_kernel(x_ref, wmu_ref, wsig_ref, epsw_ref,
                                bmu_ref, bsig_ref, epsb_ref, o_ref, acc_ref):
    k = pl.program_id(2)

    @pl.when(k == 0)
    def _():
        acc_ref[...] = jnp.zeros_like(acc_ref)

    # Reparameterized weight sample for this (tn, tk) tile: mu + softplus(sigma)*eps
    w = wmu_ref[...] + _softplus(wsig_ref[...]) * epsw_ref[...]

    # y += x @ w.T, expressed with the contraction on the last dim of BOTH
    # operands so no transpose of the sampled weight tile is materialized.
    acc_ref[...] += lax.dot_general(
        x_ref[...], w,
        dimension_numbers=(((1,), (1,)), ((), ())),
        preferred_element_type=jnp.float32)

    @pl.when(k == pl.num_programs(2) - 1)
    def _():
        b = bmu_ref[...] + _softplus(bsig_ref[...]) * epsb_ref[...]   # (1, tn)
        o_ref[...] = (acc_ref[...] + b).astype(o_ref.dtype)


def _bayes_linear_mu_kernel(x_ref, wmu_ref, bmu_ref, o_ref, acc_ref):
    # Deterministic (sample=False) fast path: mu only.  Skips the sigma/eps HBM
    # streams and the softplus entirely (~3x less HBM traffic than the old path).
    k = pl.program_id(2)

    @pl.when(k == 0)
    def _():
        acc_ref[...] = jnp.zeros_like(acc_ref)

    acc_ref[...] += lax.dot_general(
        x_ref[...], wmu_ref[...],
        dimension_numbers=(((1,), (1,)), ((), ())),
        preferred_element_type=jnp.float32)

    @pl.when(k == pl.num_programs(2) - 1)
    def _():
        o_ref[...] = (acc_ref[...] + bmu_ref[...]).astype(o_ref.dtype)


def _round_up(a, m):
    return (a + m - 1) // m * m


def bayesian_linear_forward(x, weight_mu, weight_sigma, bias_mu, bias_sigma,
                            eps_w=None, eps_b=None, sample=True,
                            tm_max=128, tn_max=256, tk_max=512):
    """Pallas forward of BayesianLinear.

    x:                   (B, in_features)   float32
    weight_mu/sigma:     (out_features, in_features)
    bias_mu/sigma:       (out_features,)
    eps_w:               (out_features, in_features) standard-normal noise (sample=True)
    eps_b:               (out_features,)             standard-normal noise (sample=True)
    """
    B, IN = x.shape
    OUT = weight_mu.shape[0]

    # Tile sizes: sublane-aligned batch tile, 128-lane-aligned OUT/IN tiles.
    # (tn, tk) <= (256, 512) keeps 3 double-buffered weight streams ~3 MiB,
    # safe under the scoped-VMEM defaults on v5e/v6e/v7x.
    tm = min(tm_max, _round_up(B, 8))
    tn = min(tn_max, _round_up(OUT, 128))
    tk = min(tk_max, _round_up(IN, 128))
    B_p, OUT_p, IN_p = _round_up(B, tm), _round_up(OUT, tn), _round_up(IN, tk)
    grid = (B_p // tm, OUT_p // tn, IN_p // tk)

    def pad2(a, rows, cols):
        return jnp.pad(a, ((0, rows - a.shape[0]), (0, cols - a.shape[1])))

    x_p = pad2(x, B_p, IN_p)
    wmu_p = pad2(weight_mu, OUT_p, IN_p)
    bmu_p = pad2(bias_mu.reshape(1, OUT), 1, OUT_p)

    x_spec = pl.BlockSpec((tm, tk), lambda i, j, k: (i, k))
    w_spec = pl.BlockSpec((tn, tk), lambda i, j, k: (j, k))
    b_spec = pl.BlockSpec((1, tn), lambda i, j, k: (0, j))
    o_spec = pl.BlockSpec((tm, tn), lambda i, j, k: (i, j))

    compiler_params = pltpu.CompilerParams(
        dimension_semantics=("parallel", "parallel", "arbitrary"))
    scratch = [pltpu.VMEM((tm, tn), jnp.float32)]

    if sample:
        wsig_p = pad2(weight_sigma, OUT_p, IN_p)
        epsw_p = pad2(eps_w, OUT_p, IN_p)            # pads are zero -> no effect
        bsig_p = pad2(bias_sigma.reshape(1, OUT), 1, OUT_p)
        epsb_p = pad2(eps_b.reshape(1, OUT), 1, OUT_p)

        out_p = pl.pallas_call(
            _bayes_linear_sample_kernel,
            out_shape=jax.ShapeDtypeStruct((B_p, OUT_p), x.dtype),
            grid=grid,
            in_specs=[x_spec, w_spec, w_spec, w_spec, b_spec, b_spec, b_spec],
            out_specs=o_spec,
            scratch_shapes=scratch,
            compiler_params=compiler_params,
        )(x_p, wmu_p, wsig_p, epsw_p, bmu_p, bsig_p, epsb_p)
    else:
        out_p = pl.pallas_call(
            _bayes_linear_mu_kernel,
            out_shape=jax.ShapeDtypeStruct((B_p, OUT_p), x.dtype),
            grid=grid,
            in_specs=[x_spec, w_spec, b_spec],
            out_specs=o_spec,
            scratch_shapes=scratch,
            compiler_params=compiler_params,
        )(x_p, wmu_p, bmu_p)

    return out_p[:B, :OUT]


def init_bayesian_linear_params(key, in_features, out_features):
    """Deterministic init mirroring the PyTorch module's init_parameters()."""
    k_w, k_b = jax.random.split(key)
    # kaiming_uniform_(mode='fan_in'): bound = sqrt(6 / fan_in)
    bound_w = np.sqrt(6.0 / in_features)
    weight_mu = jax.random.uniform(k_w, (out_features, in_features),
                                   minval=-bound_w, maxval=bound_w,
                                   dtype=jnp.float32)
    bias_mu = jax.random.uniform(k_b, (out_features,),
                                 minval=-0.2, maxval=0.2, dtype=jnp.float32)
    weight_sigma = jnp.full((out_features, in_features), -5.0, dtype=jnp.float32)
    bias_sigma = jnp.full((out_features,), -5.0, dtype=jnp.float32)
    return weight_mu, weight_sigma, bias_mu, bias_sigma


def _reference_forward(x, weight_mu, weight_sigma, bias_mu, bias_sigma,
                       eps_w, eps_b):
    weight = weight_mu + jax.nn.softplus(weight_sigma) * eps_w
    bias = bias_mu + jax.nn.softplus(bias_sigma) * eps_b
    return x @ weight.T + bias


def _run_case(key, batch, in_features, out_features, rtol, atol):
    k_param, k_x, k_epsw, k_epsb = jax.random.split(key, 4)
    weight_mu, weight_sigma, bias_mu, bias_sigma = init_bayesian_linear_params(
        k_param, in_features, out_features)

    x = jax.random.normal(k_x, (batch, in_features), dtype=jnp.float32)
    eps_w = jax.random.normal(k_epsw, (out_features, in_features),
                              dtype=jnp.float32)
    eps_b = jax.random.normal(k_epsb, (out_features,), dtype=jnp.float32)

    # sample=True path
    y = bayesian_linear_forward(x, weight_mu, weight_sigma, bias_mu, bias_sigma,
                                eps_w, eps_b, sample=True)
    y = jax.block_until_ready(y)
    y_ref = _reference_forward(x, weight_mu, weight_sigma, bias_mu, bias_sigma,
                               eps_w, eps_b)
    np.testing.assert_allclose(np.asarray(y), np.asarray(y_ref),
                               rtol=rtol, atol=atol)

    # sample=False path (mu-only fast kernel)
    y_det = bayesian_linear_forward(x, weight_mu, weight_sigma, bias_mu,
                                    bias_sigma, sample=False)
    y_det = jax.block_until_ready(y_det)
    np.testing.assert_allclose(np.asarray(y_det),
                               np.asarray(x @ weight_mu.T + bias_mu),
                               rtol=rtol, atol=atol)


if __name__ == "__main__":
    key = jax.random.PRNGKey(0)
    k_small, k_big = jax.random.split(key)

    # Small shape consistent with the module's typical classifier-head use.
    _run_case(k_small, batch=8, in_features=32, out_features=32,
              rtol=2e-5, atol=2e-5)

    # Larger shape that exercises the multi-tile grid (k-axis accumulation,
    # OUT-axis parallel tiles, and zero-padding of non-aligned dims).
    _run_case(k_big, batch=16, in_features=640, out_features=384,
              rtol=1e-4, atol=1e-4)

    print("KERNEL_OK")
</pallas_src>

<mosaic_0001>
module attributes {stable_mosaic.version = 11 : i64} {
  func.func @_bayes_linear_sample_kernel(%arg0: i32, %arg1: i32, %arg2: i32, %arg3: memref<8x128xf32, #tpu.memory_space<vmem>>, %arg4: memref<128x128xf32, #tpu.memory_space<vmem>>, %arg5: memref<128x128xf32, #tpu.memory_space<vmem>>, %arg6: memref<128x128xf32, #tpu.memory_space<vmem>>, %arg7: memref<1x128xf32, #tpu.memory_space<vmem>>, %arg8: memref<1x128xf32, #tpu.memory_space<vmem>>, %arg9: memref<1x128xf32, #tpu.memory_space<vmem>>, %arg10: memref<8x128xf32, #tpu.memory_space<vmem>>, %arg11: memref<8x128xf32, #tpu.memory_space<vmem>>) attributes {dimension_semantics = [#tpu.dimension_semantics<parallel>, #tpu.dimension_semantics<parallel>, #tpu.dimension_semantics<arbitrary>], iteration_bounds = array<i64: 1, 1, 1>, scalar_prefetch = 0 : i64, scratch_operands = 1 : i64, tpu.core_type = #tpu.core_type<tc>, window_params = [{transform_indices = @transform_0, window_bounds = array<i64: 8, 128>}, {transform_indices = @transform_1, window_bounds = array<i64: 128, 128>}, {transform_indices = @transform_2, window_bounds = array<i64: 128, 128>}, {transform_indices = @transform_3, window_bounds = array<i64: 128, 128>}, {transform_indices = @transform_4, window_bounds = array<i64: 1, 128>}, {transform_indices = @transform_5, window_bounds = array<i64: 1, 128>}, {transform_indices = @transform_6, window_bounds = array<i64: 1, 128>}, {transform_indices = @transform_7, window_bounds = array<i64: 8, 128>}]} {
    %c0_i32 = arith.constant 0 : i32
    %0 = arith.cmpi eq, %arg2, %c0_i32 : i32
    %1 = arith.extui %0 : i1 to i32
    %c0_i32_0 = arith.constant 0 : i32
    %2 = arith.cmpi ne, %1, %c0_i32_0 : i32
    scf.if %2 {
      %cst_16 = arith.constant 0.000000e+00 : f32
      %23 = vector.broadcast %cst_16 : f32 to vector<8x128xf32>
      %c0_17 = arith.constant 0 : index
      %c0_18 = arith.constant 0 : index
      %24 = vector.load %arg11[%c0_17, %c0_18] : memref<8x128xf32, #tpu.memory_space<vmem>>, vector<8x128xf32>
      tpu.vector_store %arg11[%c0_17, %c0_18], %23 {strides = array<i32>} : memref<8x128xf32, #tpu.memory_space<vmem>>, vector<8x128xf32>,
    } else {
    }
    %c0 = arith.constant 0 : index
    %c0_1 = arith.constant 0 : index
    %3 = vector.load %arg4[%c0, %c0_1] : memref<128x128xf32, #tpu.memory_space<vmem>>, vector<128x128xf32>
    %c0_2 = arith.constant 0 : index
    %c0_3 = arith.constant 0 : index
    %4 = vector.load %arg5[%c0_2, %c0_3] : memref<128x128xf32, #tpu.memory_space<vmem>>, vector<128x128xf32>
    %cst = arith.constant 2.000000e+01 : f32
    %5 = vector.broadcast %cst : f32 to vector<128x128xf32>
    %6 = arith.minimumf %4, %5 : vector<128x128xf32>
    %cst_4 = arith.constant 2.000000e+01 : f32
    %7 = vector.broadcast %cst_4 : f32 to vector<128x128xf32>
    %8 = arith.cmpf ogt, %4, %7 : vector<128x128xf32>
    %9 = math.exp %6 : vector<128x128xf32>
    %10 = math.log1p %9 : vector<128x128xf32>
    %11 = arith.select %8, %4, %10 : vector<128x128xi1>, vector<128x128xf32>
    %c0_5 = arith.constant 0 : index
    %c0_6 = arith.constant 0 : index
    %12 = vector.load %arg6[%c0_5, %c0_6] : memref<128x128xf32, #tpu.memory_space<vmem>>, vector<128x128xf32>
    %13 = arith.mulf %11, %12 : vector<128x128xf32>
    %14 = arith.addf %3, %13 : vector<128x128xf32>
    %c0_7 = arith.constant 0 : index
    %c0_8 = arith.constant 0 : index
    %15 = vector.load %arg11[%c0_7, %c0_8] : memref<8x128xf32, #tpu.memory_space<vmem>>, vector<8x128xf32>
    %c0_9 = arith.constant 0 : index
    %c0_10 = arith.constant 0 : index
    %16 = vector.load %arg3[%c0_9, %c0_10] : memref<8x128xf32, #tpu.memory_space<vmem>>, vector<8x128xf32>
    %cst_11 = arith.constant dense<0.000000e+00> : vector<8x128xf32>
    %17 = tpu.matmul %16, %14, %cst_11 {dimension_numbers = #tpu.dot_dimension_numbers<[1], [1], [0], [0], [0, 0, 1, 0], [], []>} : vector<8x128xf32>, vector<128x128xf32>, vector<8x128xf32> -> vector<8x128xf32>
    %18 = arith.addf %15, %17 : vector<8x128xf32>
    %c0_12 = arith.constant 0 : index
    %c0_13 = arith.constant 0 : index
    %19 = vector.load %arg11[%c0_12, %c0_13] : memref<8x128xf32, #tpu.memory_space<vmem>>, vector<8x128xf32>
    tpu.vector_store %arg11[%c0_12, %c0_13], %18 {strides = array<i32>} : memref<8x128xf32, #tpu.memory_space<vmem>>, vector<8x128xf32>,
    %c0_i32_14 = arith.constant 0 : i32
    %20 = arith.cmpi eq, %arg2, %c0_i32_14 : i32
    %21 = arith.extui %20 : i1 to i32
    %c0_i32_15 = arith.constant 0 : i32
    %22 = arith.cmpi ne, %21, %c0_i32_15 : i32
    scf.if %22 {
      %c0_16 = arith.constant 0 : index
      %c0_17 = arith.constant 0 : index
      %23 = vector.load %arg7[%c0_16, %c0_17] : memref<1x128xf32, #tpu.memory_space<vmem>>, vector<1x128xf32>
      %c0_18 = arith.constant 0 : index
      %c0_19 = arith.constant 0 : index
      %24 = vector.load %arg8[%c0_18, %c0_19] : memref<1x128xf32, #tpu.memory_space<vmem>>, vector<1x128xf32>
      %cst_20 = arith.constant 2.000000e+01 : f32
      %25 = vector.broadcast %cst_20 : f32 to vector<1x128xf32>
      %26 = arith.minimumf %24, %25 : vector<1x128xf32>
      %cst_21 = arith.constant 2.000000e+01 : f32
      %27 = vector.broadcast %cst_21 : f32 to vector<1x128xf32>
      %28 = arith.cmpf ogt, %24, %27 : vector<1x128xf32>
      %29 = math.exp %26 : vector<1x128xf32>
      %30 = math.log1p %29 : vector<1x128xf32>
      %31 = arith.select %28, %24, %30 : vector<1x128xi1>, vector<1x128xf32>
      %c0_22 = arith.constant 0 : index
      %c0_23 = arith.constant 0 : index
      %32 = vector.load %arg9[%c0_22, %c0_23] : memref<1x128xf32, #tpu.memory_space<vmem>>, vector<1x128xf32>
      %33 = arith.mulf %31, %32 : vector<1x128xf32>
      %34 = arith.addf %23, %33 : vector<1x128xf32>
      %c0_24 = arith.constant 0 : index
      %c0_25 = arith.constant 0 : index
      %35 = vector.load %arg11[%c0_24, %c0_25] : memref<8x128xf32, #tpu.memory_space<vmem>>, vector<8x128xf32>
      %36 = vector.broadcast %34 : vector<1x128xf32> to vector<8x128xf32>
      %37 = arith.addf %35, %36 : vector<8x128xf32>
      %c0_26 = arith.constant 0 : index
      %c0_27 = arith.constant 0 : index
      %38 = vector.load %arg10[%c0_26, %c0_27] : memref<8x128xf32, #tpu.memory_space<vmem>>, vector<8x128xf32>
      tpu.vector_store %arg10[%c0_26, %c0_27], %37 {strides = array<i32>} : memref<8x128xf32, #tpu.memory_space<vmem>>, vector<8x128xf32>,
    } else {
    }
    return
  }
  func.func @transform_0(%arg0: i32, %arg1: i32, %arg2: i32) -> (i32, i32) {
    %c0_i32 = arith.constant 0 : i32
    return %arg0, %arg2 : i32, i32
  }
  func.func @transform_1(%arg0: i32, %arg1: i32, %arg2: i32) -> (i32, i32) {
    %c0_i32 = arith.constant 0 : i32
    return %arg1, %arg2 : i32, i32
  }
  func.func @transform_2(%arg0: i32, %arg1: i32, %arg2: i32) -> (i32, i32) {
    %c0_i32 = arith.constant 0 : i32
    return %arg1, %arg2 : i32, i32
  }
  func.func @transform_3(%arg0: i32, %arg1: i32, %arg2: i32) -> (i32, i32) {
    %c0_i32 = arith.constant 0 : i32
    return %arg1, %arg2 : i32, i32
  }
  func.func @transform_4(%arg0: i32, %arg1: i32, %arg2: i32) -> (i32, i32) {
    %c0_i32 = arith.constant 0 : i32
    %c0_i32_0 = arith.constant 0 : i32
    return %c0_i32, %arg1 : i32, i32
  }
  func.func @transform_5(%arg0: i32, %arg1: i32, %arg2: i32) -> (i32, i32) {
    %c0_i32 = arith.constant 0 : i32
    %c0_i32_0 = arith.constant 0 : i32
    return %c0_i32, %arg1 : i32, i32
  }
  func.func @transform_6(%arg0: i32, %arg1: i32, %arg2: i32) -> (i32, i32) {
    %c0_i32 = arith.constant 0 : i32
    %c0_i32_0 = arith.constant 0 : i32
    return %c0_i32, %arg1 : i32, i32
  }
  func.func @transform_7(%arg0: i32, %arg1: i32, %arg2: i32) -> (i32, i32) {
    %c0_i32 = arith.constant 0 : i32
    return %arg0, %arg1 : i32, i32
  }
}

</mosaic_0001>

<bundles_post_ra>
// kernel: tpu_custom_call.1
= control target key start
LH: loop header
LB: loop body
LE: loop exit
PB: predicated region body
PF: predicated region fallthrough
CT: control target
= control target key end

     0   :  { %12 = vsyncpa [#allocation4], 0  ;;  %s1167_s0 = inlined_call_operand.hbm [shape: f32[8,128], index: 0, kind: input, shape index: {}]   ;;  %s1168_s1 = inlined_call_operand.hbm [shape: f32[128,128], index: 1, kind: input, shape index: {}]   ;;  %s1169_s2 = inlined_call_operand.hbm [shape: f32[128,128], index: 2, kind: input, shape index: {}]   ;;  %s1170_s3 = inlined_call_operand.hbm [shape: f32[128,128], index: 3, kind: input, shape index: {}]   ;;  %s1171_s4 = inlined_call_operand.vmem [shape: f32[1,128], index: 4, kind: input, shape index: {}]   ;;  %s1172_s5 = inlined_call_operand.vmem [shape: f32[1,128], index: 5, kind: input, shape index: {}]   ;;  %s1173_s6 = inlined_call_operand.vmem [shape: f32[1,128], index: 6, kind: input, shape index: {}]   ;;  %s1174_s7 = inlined_call_operand.hbm [shape: f32[8,128], index: 7, kind: output, shape index: {}]  }
   0x1   :  { %13 = vsyncpa [#allocation7], 0 }
   0x2   :  { %14 = vsyncpa [#allocation10], 0 }
   0x3   :  { %15 = vsyncpa [#allocation5], 0  ;;  %s783_s24 = smov [#allocation6]   ;;  %s665_s28 = scalar_lea.hbm %s1168_s1, 2048 }
   0x4   :  { %s31_s25 = sshll.u32 %s783_s24, 4  ;;  %p666_p0 = scmp.ne.s32.totalorder %s1168_s1, %s665_s28  ;;  %s32_s25 = int_to_ptr.vmem [resolvable:$true] %s31_s25 }
   0x5   :  { %p669_p1 = scmp.lt.u32.totalorder %s665_s28, %s1168_s1 }
   0x7   :  { %p671_p2 = pnand %p669_p1, %p666_p0 }
   0x9   :  { %674 = shalt.err (!%p671_p2)
}
   0xa   :  { %s675_s10 = scalar_lea.vmem %s32_s25, 2048  ;;  %p680_p4 = scmp.lt.s32.totalorder %s32_s25, %s32_s25 }
   0xb   :  { %p676_p3 = scmp.ne.s32.totalorder %s32_s25, %s675_s10  ;;  %p681_p5 = scmp.lt.s32.totalorder %s675_s10, %s675_s10 }
   0xd   :  { %p682_p6 = por %p681_p5, %p680_p4 }
   0xf   :  { %p683_p7 = pnand %p682_p6, %p676_p3 }
  0x11   :  { %686 = shalt.err (!%p683_p7)
}
  0x12   :  { %s784_s11 = smov 128   ;;  %s785_s12 = smov 8  }
  0x13   :  { %37 = dma.hbm_to_vmem [thread:$0]  %s1168_s1, 2048, %s32_s25, [#allocation7], %s784_s11, %s784_s11, %s785_s12  }
  0x14   :  { %s786_s15 = smov [#allocation3]   ;;  %s787_s17 = smov [#allocation8]  }
  0x15   :  { %s22_s16 = sshll.u32 %s786_s15, 4  ;;  %s43_s18 = sshll.u32 %s787_s17, 4  ;;  %s23_s16 = int_to_ptr.vmem [resolvable:$true] %s22_s16  ;;  %s44_s18 = int_to_ptr.vmem [resolvable:$true] %s43_s18 }
  0x16   :  { %s687_s21 = scalar_lea.hbm %s1167_s0, 128 }
  0x17   :  { %p688_p8 = scmp.ne.s32.totalorder %s1167_s0, %s687_s21  ;;  %p691_p9 = scmp.lt.u32.totalorder %s687_s21, %s1167_s0 }
  0x19   :  { %p693_p10 = pnand %p691_p9, %p688_p8 }
  0x1b   :  { %696 = shalt.err (!%p693_p10)
}
  0x1c   :  { %s697_s1 = scalar_lea.vmem %s23_s16, 128  ;;  %p702_p12 = scmp.lt.s32.totalorder %s23_s16, %s23_s16 }
  0x1d   :  { %p698_p11 = scmp.ne.s32.totalorder %s23_s16, %s697_s1  ;;  %p703_p13 = scmp.lt.s32.totalorder %s697_s1, %s697_s1 }
  0x1f   :  { %p704_p0 = por %p703_p13, %p702_p12 }
  0x21   :  { %p705_p1 = pnand %p704_p0, %p698_p11 }
  0x23   :  { %708 = shalt.err (!%p705_p1)
}
  0x24   :  { %25 = dma.hbm_to_vmem [thread:$0]  %s1167_s0, 128, %s23_s16, [#allocation4]  }
  0x25   :  { %s709_s30 = scalar_lea.hbm %s1169_s2, 2048 }
  0x26   :  { %p710_p2 = scmp.ne.s32.totalorder %s1169_s2, %s709_s30  ;;  %p713_p3 = scmp.lt.u32.totalorder %s709_s30, %s1169_s2 }
  0x28   :  { %p715_p4 = pnand %p713_p3, %p710_p2 }
  0x2a   :  { %718 = shalt.err (!%p715_p4)
}
  0x2b   :  { %s719_s14 = scalar_lea.vmem %s44_s18, 2048  ;;  %p724_p6 = scmp.lt.s32.totalorder %s44_s18, %s44_s18 }
  0x2c   :  { %p720_p5 = scmp.ne.s32.totalorder %s44_s18, %s719_s14  ;;  %p725_p7 = scmp.lt.s32.totalorder %s719_s14, %s719_s14 }
  0x2e   :  { %p726_p8 = por %p725_p7, %p724_p6 }
  0x30   :  { %p727_p9 = pnand %p726_p8, %p720_p5 }
  0x32   :  { %730 = shalt.err (!%p727_p9)
}
  0x33   :  { %49 = dma.hbm_to_vmem [thread:$0]  %s1169_s2, 2048, %s44_s18, [#allocation7], %s784_s11, %s784_s11, %s785_s12  }
  0x34   :  { %s788_s16 = smov [#allocation9]   ;;  %s731_s21 = scalar_lea.hbm %s1170_s3, 2048 }
  0x35   :  { %s55_s17 = sshll.u32 %s788_s16, 4  ;;  %p732_p10 = scmp.ne.s32.totalorder %s1170_s3, %s731_s21  ;;  %s56_s17 = int_to_ptr.vmem [resolvable:$true] %s55_s17 }
  0x36   :  { %p735_p11 = scmp.lt.u32.totalorder %s731_s21, %s1170_s3 }
  0x38   :  { %p737_p12 = pnand %p735_p11, %p732_p10 }
  0x3a   :  { %740 = shalt.err (!%p737_p12)
}
  0x3b   :  { %s741_s1 = scalar_lea.vmem %s56_s17, 2048  ;;  %p746_p0 = scmp.lt.s32.totalorder %s56_s17, %s56_s17 }
  0x3c   :  { %p742_p13 = scmp.ne.s32.totalorder %s56_s17, %s741_s1  ;;  %p747_p1 = scmp.lt.s32.totalorder %s741_s1, %s741_s1 }
  0x3e   :  { %p748_p2 = por %p747_p1, %p746_p0 }
  0x40   :  { %p749_p3 = pnand %p748_p2, %p742_p13 }
  0x42   :  { %752 = shalt.err (!%p749_p3)
}
  0x43   :  { %61 = dma.hbm_to_vmem [thread:$0]  %s1170_s3, 2048, %s56_s17, [#allocation10], %s784_s11, %s784_s11, %s785_s12  }
  0x44   :  { %775 = dma.done.wait [#allocation4], 128  }
  0x45   :  { %776 = vsyncadd [#allocation4], 4294967168 }
  0x46   :  { %777 = dma.done.wait [#allocation7], 4096  }
  0x47   :  { %778 = vsyncadd [#allocation7], 4294963200 }
  0x48   :  { %779 = dma.done.wait [#allocation10], 2048  }
  0x49   :  { %780 = vsyncadd [#allocation10], 4294965248  ;;  %v789_v0 = vmov 0.0|0.0   ;;  %vm790_vm0 = vmmov 0   ;;  %v791_v1 = vmov 0.0   ;;  %v891_v2 = vld [vmem:[#allocation8] sm:$0xff] }
  0x4a   :  { %563 = vmatprep.subr.bf16.mxu0 %v789_v0  ;;  %560 = vmatprep.mubr.msk.f32.mxu0 %vm790_vm0, %v791_v1  ;;  %v893_v3 = vld [vmem:[#allocation8 + $0x8] sm:$0xff]  ;;  %v117_v4 = vmin.f32 %v891_v2, 20.0  ;;  %v897_v6 = vld [vmem:[#allocation8 + $0x10] sm:$0xff]  ;;  %v899_v8 = vld [vmem:[#allocation8 + $0x18] sm:$0xff]  ;;  %vm133_vm1 = vcmp.gt.f32.partialorder %v891_v2, 20.0  ;;  %s792_s28 = smov [#allocation11]  }
  0x4b   :  { %v118_v5 = vmin.f32 %v893_v3, 20.0  ;;  %v119_v9 = vmin.f32 %v897_v6, 20.0  ;;  %v120_v11 = vmin.f32 %v899_v8, 20.0  ;;  %v903_v13 = vld [vmem:[#allocation8 + $0x20] sm:$0xff]  ;;  %v905_v14 = vld [vmem:[#allocation8 + $0x28] sm:$0xff]  ;;  %v909_v18 = vld [vmem:[#allocation8 + $0x30] sm:$0xff] }
  0x4c   :  { %v149_v7 = vmul.f32 1.442695, %v117_v4  ;;  %v121_v16 = vmin.f32 %v903_v13, 20.0  ;;  %v122_v17 = vmin.f32 %v905_v14, 20.0  ;;  %v911_v21 = vld [vmem:[#allocation8 + $0x38] sm:$0xff]  ;;  %v123_v22 = vmin.f32 %v909_v18, 20.0 }
  0x4d   :  { %v151_v10 = vmul.f32 1.442695, %v118_v5  ;;  %v153_v12 = vmul.f32 1.442695, %v119_v9  ;;  %v155_v15 = vmul.f32 1.442695, %v120_v11 }
  0x4e   :  { %597 = vpow2.f32 %v149_v7  ;;  %v157_v19 = vmul.f32 1.442695, %v121_v16  ;;  %v159_v20 = vmul.f32 1.442695, %v122_v17  ;;  %v124_v23 = vmin.f32 %v911_v21, 20.0  ;;  %v915_v25 = vld [vmem:[#allocation8 + $0x40] sm:$0xff] }
  0x4f   :  { %599 = vpow2.f32 %v151_v10  ;;  %v161_v24 = vmul.f32 1.442695, %v123_v22  ;;  %v917_v26 = vld [vmem:[#allocation8 + $0x48] sm:$0xff]  ;;  %v125_v28 = vmin.f32 %v915_v25, 20.0  ;;  %v920_v29 = vld [vmem:[#allocation8 + $0x50] sm:$0xff]  ;;  %vm134_vm2 = vcmp.gt.f32.partialorder %v893_v3, 20.0 }
  0x50   :  { %601 = vpow2.f32 %v153_v12  ;;  %v163_v27 = vmul.f32 1.442695, %v124_v23  ;;  %v126_v30 = vmin.f32 %v917_v26, 20.0  ;;  %v127_v33 = vmin.f32 %v920_v29, 20.0  ;;  %s500_s29 = sshll.u32 %s792_s28, 4  ;;  %s501_s29 = int_to_ptr.vmem [resolvable:$true] %s500_s29 }
  0x51   :  { %603 = vpow2.f32 %v155_v15  ;;  %v165_v31 = vmul.f32 1.442695, %v125_v28  ;;  %vm135_vm3 = vcmp.gt.f32.partialorder %v897_v6, 20.0  ;;  %vm136_vm5 = vcmp.gt.f32.partialorder %v899_v8, 20.0  ;;  %s753_s30 = scalar_lea.vmem %s501_s29, 128  ;;  %p758_p5 = scmp.lt.s32.totalorder %s501_s29, %s501_s29 }
  0x52   :  { %605 = vpow2.f32 %v157_v19  ;;  %v167_v38 = vmul.f32 1.442695, %v126_v30  ;;  %v169_v43 = vmul.f32 1.442695, %v127_v33  ;;  %vm137_vm9 = vcmp.gt.f32.partialorder %v903_v13, 20.0  ;;  %p754_p4 = scmp.ne.s32.totalorder %s501_s29, %s753_s30  ;;  %p759_p6 = scmp.lt.s32.totalorder %s753_s30, %s753_s30 }
  0x53   :  { %607 = vpow2.f32 %v159_v20  ;;  %vm138_vm11 = vcmp.gt.f32.partialorder %v905_v14, 20.0  ;;  %vm139_vm15 = vcmp.gt.f32.partialorder %v909_v18, 20.0  ;;  %vm140_vm0 = vcmp.gt.f32.partialorder %v911_v21, 20.0 }
  0x54   :  { %609 = vpow2.f32 %v161_v24  ;;  %p760_p7 = por %p759_p6, %p758_p5 }
  0x55   :  { %611 = vpow2.f32 %v163_v27 }
  0x56   :  { %613 = vpow2.f32 %v165_v31  ;;  %v341_v31 = vld [vmem:[#allocation9] sm:$0xff]  ;;  %p761_p8 = pnand %p760_p7, %p754_p4 }
  0x58   :  { %v598_v32 = vpop.eup %597 }
  0x59   :  { %v600_v34 = vpop.eup %599  ;;  %v181_v35 = vadd.f32 1.0, %v598_v32  ;;  %v184_v41 = vmul.f32 -0.5, %v598_v32  ;;  %v187_v48 = vand.u32 2147483647, %v598_v32 }
  0x5a   :  { %v602_v36 = vpop.eup %601  ;;  %v190_v37 = vadd.f32 1.0, %v600_v34  ;;  %v193_v42 = vmul.f32 -0.5, %v600_v34  ;;  %v196_v51 = vand.u32 2147483647, %v600_v34 }
  0x5b   :  { %v604_v39 = vpop.eup %603  ;;  %615 = vlog2.f32 %v181_v35  ;;  %v199_v40 = vadd.f32 1.0, %v602_v36  ;;  %v202_v45 = vmul.f32 -0.5, %v602_v36  ;;  %v185_v54 = vadd.f32 1.0, %v184_v41 }
  0x5c   :  { %617 = vlog2.f32 %v190_v37  ;;  %v606_v44 = vpop.eup %605  ;;  %v208_v46 = vadd.f32 1.0, %v604_v39  ;;  %v211_v49 = vmul.f32 -0.5, %v604_v39  ;;  %v194_v55 = vadd.f32 1.0, %v193_v42  ;;  %v342_v37 = vld [vmem:[#allocation9 + $0x8] sm:$0xff]  ;;  %v85_v42 = vld [vmem:[#allocation6] sm:$0xff] }
  0x5d   :  { %619 = vlog2.f32 %v199_v40  ;;  %v924_v47 = vpop.eup %607  ;;  %v217_v52 = vadd.f32 1.0, %v606_v44  ;;  %v220_v53 = vmul.f32 -0.5, %v606_v44  ;;  %v205_v56 = vand.u32 2147483647, %v602_v36 }
  0x5e   :  { %621 = vpow2.f32 %v167_v38  ;;  %v927_v50 = vpop.eup %609  ;;  %v203_v58 = vadd.f32 1.0, %v202_v45  ;;  %v214_v59 = vand.u32 2147483647, %v604_v39  ;;  %v226_v60 = vadd.f32 1.0, %v924_v47 }
  0x5f   :  { %623 = vlog2.f32 %v208_v46  ;;  %v931_v57 = vpop.eup %611  ;;  %vm934_vm4 = vcmp.lt.f32.partialorder %v187_v48, 0.0004427343  ;;  %v212_v62 = vadd.f32 1.0, %v211_v49  ;;  %v223_v63 = vand.u32 2147483647, %v606_v44  ;;  %v86_v49 = vld [vmem:[#allocation6 + $0x8] sm:$0xff] }
  0x60   :  { %625 = vpow2.f32 %v169_v43  ;;  %v235_v1 = vadd.f32 1.0, %v927_v50  ;;  %vm940_vm6 = vcmp.lt.f32.partialorder %v196_v51, 0.0004427343  ;;  %v221_v5 = vadd.f32 1.0, %v220_v53  ;;  %v945_v9 = vpop.eup %613 }
  0x61   :  { %627 = vlog2.f32 %v217_v52  ;;  %v229_v7 = vmul.f32 -0.5, %v924_v47  ;;  %v186_v10 = vmul.f32 %v598_v32, %v185_v54  ;;  %v232_v11 = vand.u32 2147483647, %v924_v47 }
  0x62   :  { %629 = vlog2.f32 %v226_v60  ;;  %v244_v12 = vadd.f32 1.0, %v931_v57  ;;  %v195_v16 = vmul.f32 %v600_v34, %v194_v55  ;;  %v204_v17 = vmul.f32 %v602_v36, %v203_v58  ;;  %v343_v55 = vld [vmem:[#allocation9 + $0x10] sm:$0xff] }
  0x63   :  { %631 = vlog2.f32 %v235_v1  ;;  %vm949_vm7 = vcmp.lt.f32.partialorder %v205_v56, 0.0004427343  ;;  %vm953_vm8 = vcmp.lt.f32.partialorder %v214_v59, 0.0004427343  ;;  %v213_v24 = vmul.f32 %v604_v39, %v212_v62  ;;  %v344_v59 = vld [vmem:[#allocation9 + $0x18] sm:$0xff] }
  0x64   :  { %vm958_vm10 = vcmp.lt.f32.partialorder %v223_v63, 0.0004427343  ;;  %633 = vlog2.f32 %v244_v12  ;;  %v222_v32 = vmul.f32 %v606_v44, %v221_v5  ;;  %v230_v33 = vadd.f32 1.0, %v229_v7  ;;  %v88_v12 = vld [vmem:[#allocation6 + $0x18] sm:$0xff] }
  0x65   :  { %v616_v15 = vpop.eup %615  ;;  %v238_v34 = vmul.f32 -0.5, %v927_v50  ;;  %vm968_vm12 = vcmp.lt.f32.partialorder %v232_v11, 0.0004427343  ;;  %v253_v40 = vadd.f32 1.0, %v945_v9  ;;  %v241_v45 = vand.u32 2147483647, %v927_v50 }
  0x66   :  { %v618_v22 = vpop.eup %617  ;;  %v183_v23 = vmul.f32 0.6931472, %v616_v15  ;;  %v247_v46 = vmul.f32 -0.5, %v931_v57  ;;  %v231_v60 = vmul.f32 %v924_v47, %v230_v33  ;;  %v87_v47 = vld [vmem:[#allocation6 + $0x10] sm:$0xff] }
  0x67   :  { %v620_v28 = vpop.eup %619  ;;  %v192_v30 = vmul.f32 0.6931472, %v618_v22  ;;  %v239_v61 = vadd.f32 1.0, %v238_v34  ;;  %635 = vlog2.f32 %v253_v40  ;;  %v250_v22 = vand.u32 2147483647, %v931_v57  ;;  %v345_v34 = vld [vmem:[#allocation9 + $0x20] sm:$0xff] }
  0x68   :  { %v964_v35 = vpop.eup %621  ;;  %v189_v36 = vsel %vm934_vm4, %v186_v10, %v183_v23  ;;  %v201_v38 = vmul.f32 0.6931472, %v620_v28  ;;  %v248_v19 = vadd.f32 1.0, %v247_v46  ;;  %v256_v23 = vmul.f32 -0.5, %v945_v9  ;;  %v89_v46 = vld [vmem:[#allocation6 + $0x20] sm:$0xff] }
  0x69   :  { %v624_v41 = vpop.eup %623  ;;  %v198_v43 = vsel %vm940_vm6, %v195_v16, %v192_v30  ;;  %v325_v44 = vsel %vm133_vm1, %v891_v2, %v189_v36  ;;  %v262_v10 = vadd.f32 1.0, %v964_v35  ;;  %v240_v28 = vmul.f32 %v927_v50, %v239_v61 }
  0x6a   :  { %v980_v48 = vpop.eup %625  ;;  %v326_v51 = vsel %vm134_vm2, %v893_v3, %v198_v43  ;;  %v357_v52 = vmul.f32 %v341_v31, %v325_v44  ;;  %v207_v53 = vsel %vm949_vm7, %v204_v17, %v201_v38  ;;  %v210_v54 = vmul.f32 0.6931472, %v624_v41 }
  0x6b   :  { %v628_v56 = vpop.eup %627  ;;  %v358_v58 = vmul.f32 %v342_v37, %v326_v51  ;;  %v327_v2 = vsel %vm135_vm3, %v897_v6, %v207_v53  ;;  %v997_v6 = vld [vmem:[#allocation8 + $0x58] sm:$0xff]  ;;  %637 = vlog2.f32 %v262_v10  ;;  %vm1006_vm13 = vcmp.lt.f32.partialorder %v241_v45, 0.0004427343  ;;  %v346_v37 = vld [vmem:[#allocation9 + $0x28] sm:$0xff] }
  0x6c   :  { %v373_v62 = vadd.f32 %v357_v52, %v85_v42  ;;  %v216_v3 = vsel %vm953_vm8, %v213_v24, %v210_v54  ;;  %v219_v63 = vmul.f32 0.6931472, %v628_v56  ;;  %v630_v1 = vpop.eup %629  ;;  %v359_v7 = vmul.f32 %v343_v55, %v327_v2  ;;  %v1031_v51 = vld [vmem:[#allocation8 + $0x68] sm:$0xff] }
  0x6d   :  { %v374_v4 = vadd.f32 %v358_v58, %v86_v49  ;;  %v328_v5 = vsel %vm136_vm5, %v899_v8, %v216_v3  ;;  %v632_v11 = vpop.eup %631  ;;  %v228_v17 = vmul.f32 0.6931472, %v630_v1  ;;  %v128_v27 = vmin.f32 %v997_v6, 20.0  ;;  %v1029_v49 = vld [vmem:[#allocation8 + $0x60] sm:$0xff]  ;;  %v90_v53 = vld [vmem:[#allocation6 + $0x28] sm:$0xff] }
  0x6e   :  { %v360_v15 = vmul.f32 %v344_v59, %v328_v5  ;;  %v225_v16 = vsel %vm958_vm10, %v222_v32, %v219_v63  ;;  %v634_v8 = vpop.eup %633  ;;  %v375_v31 = vadd.f32 %v359_v7, %v87_v47  ;;  %v237_v36 = vmul.f32 0.6931472, %v632_v11  ;;  %v1046_v63 = vld [vmem:[#allocation8 + $0x78] sm:$0xff]  ;;  %v347_v7 = vld [vmem:[#allocation9 + $0x30] sm:$0xff] }
  0x6f   :  { %v564_v20 = vpack.c.bf16 %v374_v4, %v373_v62  ;;  %v234_v24 = vsel %vm968_vm12, %v231_v60, %v228_v17  ;;  %v329_v33 = vsel %vm137_vm9, %v903_v13, %v225_v16  ;;  %v246_v38 = vmul.f32 0.6931472, %v634_v8  ;;  %v1042_v60 = vld [vmem:[#allocation8 + $0x70] sm:$0xff]  ;;  %v348_v11 = vld [vmem:[#allocation9 + $0x38] sm:$0xff] }
  0x70   :  { %v376_v32 = vadd.f32 %v360_v15, %v88_v12  ;;  %v330_v50 = vsel %vm138_vm11, %v905_v14, %v234_v24  ;;  %v249_v39 = vmul.f32 %v931_v57, %v248_v19  ;;  %v265_v40 = vmul.f32 -0.5, %v964_v35  ;;  %v91_v8 = vld [vmem:[#allocation6 + $0x30] sm:$0xff] }
  0x71   :  { %565 = vmatpush3.bf16.xpose.msra.mxu0 %v564_v20  ;;  %vm1020_vm14 = vcmp.lt.f32.partialorder %v250_v22, 0.0004427343  ;;  %v257_v42 = vadd.f32 1.0, %v256_v23  ;;  %v259_v13 = vand.u32 2147483647, %v945_v9  ;;  %v361_v43 = vmul.f32 %v345_v34, %v329_v33  ;;  %v636_v52 = vpop.eup %635 }
  0x72   :  { %566 = vmatprep.subr.bf16.mxu0 %v789_v0  ;;  %v171_v44 = vmul.f32 1.442695, %v128_v27  ;;  %v567_v45 = vpack.c.bf16 %v376_v32, %v375_v31  ;;  %v362_v14 = vmul.f32 %v346_v37, %v330_v50  ;;  %v243_v57 = vsel %vm1006_vm13, %v240_v28, %v237_v36  ;;  %v92_v28 = vld [vmem:[#allocation6 + $0x38] sm:$0xff] }
  0x73   :  { %v252_v54 = vsel %vm1020_vm14, %v249_v39, %v246_v38  ;;  %v266_v55 = vadd.f32 1.0, %v265_v40  ;;  %v271_v56 = vadd.f32 1.0, %v980_v48  ;;  %v258_v58 = vmul.f32 %v945_v9, %v257_v42  ;;  %v349_v38 = vld [vmem:[#allocation9 + $0x40] sm:$0xff]  ;;  %v350_v39 = vld [vmem:[#allocation9 + $0x48] sm:$0xff] }
  0x74   :  { %639 = vpow2.f32 %v171_v44  ;;  %vm1037_vm1 = vcmp.lt.f32.partialorder %v259_v13, 0.0004427343  ;;  %v268_v59 = vand.u32 2147483647, %v964_v35  ;;  %v377_v61 = vadd.f32 %v361_v43, %v89_v46 }
  0x75   :  { %641 = vlog2.f32 %v271_v56  ;;  %v129_v62 = vmin.f32 %v1029_v49, 20.0  ;;  %v130_v3 = vmin.f32 %v1031_v51, 20.0  ;;  %v638_v1 = vpop.eup %637  ;;  %v378_v4 = vadd.f32 %v362_v14, %v90_v53  ;;  %v93_v14 = vld [vmem:[#allocation6 + $0x40] sm:$0xff] }
  0x76   :  { %v331_v9 = vsel %vm139_vm15, %v909_v18, %v243_v57  ;;  %v332_v5 = vsel %vm140_vm0, %v911_v21, %v252_v54  ;;  %v255_v10 = vmul.f32 0.6931472, %v636_v52  ;;  %v264_v47 = vmul.f32 0.6931472, %v638_v1 }
  0x77   :  { %v267_v12 = vmul.f32 %v964_v35, %v266_v55  ;;  %v173_v15 = vmul.f32 1.442695, %v129_v62  ;;  %v131_v16 = vmin.f32 %v1042_v60, 20.0  ;;  %vm1057_vm2 = vcmp.lt.f32.partialorder %v268_v59, 0.0004427343 }
  0x78   :  { %v274_v18 = vmul.f32 -0.5, %v980_v48  ;;  %v175_v19 = vmul.f32 1.442695, %v130_v3  ;;  %v132_v21 = vmin.f32 %v1046_v63, 20.0  ;;  %v363_v20 = vmul.f32 %v347_v7, %v331_v9  ;;  %v351_v3 = vld [vmem:[#allocation9 + $0x50] sm:$0xff] }
  0x79   :  { %568 = vmatpush3.bf16.xpose.msra.mxu0 %v567_v45  ;;  %vm141_vm3 = vcmp.gt.f32.partialorder %v915_v25, 20.0  ;;  %643 = vpow2.f32 %v173_v15  ;;  %v177_v22 = vmul.f32 1.442695, %v131_v16  ;;  %v570_v23 = vpack.c.bf16 %v378_v4, %v377_v61  ;;  %v354_v45 = vld [vmem:[#allocation9 + $0x68] sm:$0xff] }
  0x7a   :  { %569 = vmatprep.subr.bf16.mxu0 %v789_v0  ;;  %v364_v35 = vmul.f32 %v348_v11, %v332_v5  ;;  %645 = vpow2.f32 %v175_v19  ;;  %v179_v24 = vmul.f32 1.442695, %v132_v21  ;;  %vm142_vm4 = vcmp.gt.f32.partialorder %v917_v26, 20.0  ;;  %v352_v19 = vld [vmem:[#allocation9 + $0x58] sm:$0xff] }
  0x7b   :  { %v261_v30 = vsel %vm1037_vm1, %v258_v58, %v255_v10  ;;  %v270_v27 = vsel %vm1057_vm2, %v267_v12, %v264_v47  ;;  %647 = vpow2.f32 %v177_v22  ;;  %v275_v31 = vadd.f32 1.0, %v274_v18 }
  0x7c   :  { %649 = vpow2.f32 %v179_v24  ;;  %v379_v33 = vadd.f32 %v363_v20, %v91_v8  ;;  %v277_v34 = vand.u32 2147483647, %v980_v48  ;;  %v380_v36 = vadd.f32 %v364_v35, %v92_v28  ;;  %v96_v8 = vld [vmem:[#allocation6 + $0x58] sm:$0xff] }
  0x7d   :  { %v333_v50 = vsel %vm141_vm3, %v915_v25, %v261_v30  ;;  %v334_v37 = vsel %vm142_vm4, %v917_v26, %v270_v27  ;;  %v276_v13 = vmul.f32 %v980_v48, %v275_v31  ;;  %v94_v26 = vld [vmem:[#allocation6 + $0x48] sm:$0xff]  ;;  %vm143_vm6 = vcmp.gt.f32.partialorder %v920_v29, 20.0 }
  0x7e   :  { %v640_v32 = vpop.eup %639  ;;  %v365_v43 = vmul.f32 %v349_v38, %v333_v50  ;;  %v366_v44 = vmul.f32 %v350_v39, %v334_v37  ;;  %vm1076_vm5 = vcmp.lt.f32.partialorder %v277_v34, 0.0004427343  ;;  %v573_v25 = vpack.c.bf16 %v380_v36, %v379_v33 }
  0x7f   :  { %v280_v40 = vadd.f32 1.0, %v640_v32  ;;  %v642_v41 = vpop.eup %641  ;;  %v283_v46 = vmul.f32 -0.5, %v640_v32  ;;  %v286_v61 = vand.u32 2147483647, %v640_v32  ;;  %vm144_vm8 = vcmp.gt.f32.partialorder %v997_v6, 20.0 }
  0x80   :  { %v273_v42 = vmul.f32 0.6931472, %v642_v41  ;;  %v381_v55 = vadd.f32 %v365_v43, %v93_v14  ;;  %v382_v56 = vadd.f32 %v366_v44, %v94_v26  ;;  %vm145_vm10 = vcmp.gt.f32.partialorder %v1029_v49, 20.0  ;;  %v353_v41 = vld [vmem:[#allocation9 + $0x60] sm:$0xff] }
  0x81   :  { %571 = vmatpush3.bf16.xpose.msra.mxu0 %v570_v23  ;;  %651 = vlog2.f32 %v280_v40  ;;  %v284_v58 = vadd.f32 1.0, %v283_v46  ;;  %vm1091_vm7 = vcmp.lt.f32.partialorder %v286_v61, 0.0004427343  ;;  %vm146_vm12 = vcmp.gt.f32.partialorder %v1031_v51, 20.0  ;;  %v97_v26 = vld [vmem:[#allocation6 + $0x60] sm:$0xff] }
  0x82   :  { %572 = vmatprep.subr.bf16.mxu0 %v789_v0  ;;  %v279_v53 = vsel %vm1076_vm5, %v276_v13, %v273_v42  ;;  %v576_v7 = vpack.c.bf16 %v382_v56, %v381_v55  ;;  %vm147_vm13 = vcmp.gt.f32.partialorder %v1042_v60, 20.0  ;;  %vm148_vm0 = vcmp.gt.f32.partialorder %v1046_v63, 20.0 }
  0x83   :  { %v644_v57 = vpop.eup %643  ;;  %v335_v62 = vsel %vm143_vm6, %v920_v29, %v279_v53  ;;  %v285_v10 = vmul.f32 %v640_v32, %v284_v58  ;;  %v95_v29 = vld [vmem:[#allocation6 + $0x50] sm:$0xff] }
  0x84   :  { %v646_v52 = vpop.eup %645  ;;  %v289_v54 = vadd.f32 1.0, %v644_v57  ;;  %v292_v1 = vmul.f32 -0.5, %v644_v57  ;;  %v367_v12 = vmul.f32 %v351_v3, %v335_v62  ;;  %v295_v21 = vand.u32 2147483647, %v644_v57  ;;  %v356_v3 = vld [vmem:[#allocation9 + $0x78] sm:$0xff] }
  0x85   :  { %v1083_v48 = vpop.eup %647  ;;  %v298_v2 = vadd.f32 1.0, %v646_v52  ;;  %v301_v9 = vmul.f32 -0.5, %v646_v52  ;;  %v304_v23 = vand.u32 2147483647, %v646_v52 }
  0x86   :  { %v1085_v59 = vpop.eup %649  ;;  %653 = vlog2.f32 %v289_v54  ;;  %v307_v4 = vadd.f32 1.0, %v1083_v48  ;;  %v310_v15 = vmul.f32 -0.5, %v1083_v48  ;;  %v293_v17 = vadd.f32 1.0, %v292_v1 }
  0x87   :  { %655 = vlog2.f32 %v298_v2  ;;  %v316_v5 = vadd.f32 1.0, %v1085_v59  ;;  %v319_v18 = vmul.f32 -0.5, %v1085_v59  ;;  %v302_v20 = vadd.f32 1.0, %v301_v9 }
  0x88   :  { %657 = vlog2.f32 %v307_v4  ;;  %v383_v24 = vadd.f32 %v367_v12, %v95_v29  ;;  %v311_v28 = vadd.f32 1.0, %v310_v15  ;;  %v294_v27 = vmul.f32 %v644_v57, %v293_v17  ;;  %v390_v29 = vld [vmem:[#allocation3] sm:$0xff] }
  0x89   :  { %574 = vmatpush3.bf16.xpose.msra.mxu0 %v573_v25  ;;  %659 = vlog2.f32 %v316_v5  ;;  %v313_v31 = vand.u32 2147483647, %v1083_v48  ;;  %v320_v32 = vadd.f32 1.0, %v319_v18  ;;  %vm1103_vm9 = vcmp.lt.f32.partialorder %v295_v21, 0.0004427343 }
  0x8a   :  { %575 = vmatprep.subr.bf16.mxu0 %v789_v0  ;;  %v303_v36 = vmul.f32 %v646_v52, %v302_v20  ;;  %v322_v50 = vand.u32 2147483647, %v1085_v59  ;;  %vm1109_vm11 = vcmp.lt.f32.partialorder %v304_v23, 0.0004427343  ;;  %v312_v42 = vmul.f32 %v1083_v48, %v311_v28  ;;  %v98_v48 = vld [vmem:[#allocation6 + $0x68] sm:$0xff] }
  0x8b   :  { %v652_v11 = vpop.eup %651  ;;  %vm1118_vm14 = vcmp.lt.f32.partialorder %v313_v31, 0.0004427343  ;;  %v321_v25 = vmul.f32 %v1085_v59, %v320_v32  ;;  %v482_v28 = vld [vmem:[%s1173_s6] sm:$0x1] }
  0x8c   :  { %v282_v16 = vmul.f32 0.6931472, %v652_v11  ;;  %vm1128_vm15 = vcmp.lt.f32.partialorder %v322_v50, 0.0004427343  ;;  %v100_v11 = vld [vmem:[#allocation6 + $0x78] sm:$0xff] }
  0x8d   :  { %v466_v31 = vld [vmem:[%s1171_s4] sm:$0x1] }
  0x8e   :  { %v288_v22 = vsel %vm1091_vm7, %v285_v10, %v282_v16  ;;  %v99_v10 = vld [vmem:[#allocation6 + $0x70] sm:$0xff] }
  0x8f   :  { %v336_v35 = vsel %vm144_vm8, %v997_v6, %v288_v22 }
  0x90   :  { %v368_v30 = vmul.f32 %v352_v19, %v336_v35  ;;  %v654_v33 = vpop.eup %653  ;;  %v487_v35 = vlaneseq }
  0x91   :  { %577 = vmatpush3.bf16.xpose.msra.mxu0 %v576_v7  ;;  %v656_v37 = vpop.eup %655  ;;  %v291_v6 = vmul.f32 0.6931472, %v654_v33 }
  0x92   :  { %578 = vmatprep.subr.bf16.mxu0 %v789_v0  ;;  %v384_v38 = vadd.f32 %v368_v30, %v96_v8  ;;  %v300_v40 = vmul.f32 0.6931472, %v656_v37  ;;  %v658_v13 = vpop.eup %657 }
  0x93   :  { %v297_v44 = vsel %vm1103_vm9, %v294_v27, %v291_v6  ;;  %v660_v14 = vpop.eup %659  ;;  %v309_v53 = vmul.f32 0.6931472, %v658_v13  ;;  %v488_v27 = vshrl.u32 %v487_v35, 7 }
  0x94   :  { %v579_v43 = vpack.c.bf16 %v384_v38, %v383_v24  ;;  %v306_v57 = vsel %vm1109_vm11, %v303_v36, %v300_v40  ;;  %v337_v52 = vsel %vm145_vm10, %v1029_v49, %v297_v44  ;;  %v318_v58 = vmul.f32 0.6931472, %v660_v14 }
  0x95   :  { %v338_v55 = vsel %vm146_vm12, %v1031_v51, %v306_v57  ;;  %v369_v56 = vmul.f32 %v353_v41, %v337_v52  ;;  %v315_v59 = vsel %vm1118_vm14, %v312_v42, %v309_v53  ;;  %v355_v51 = vld [vmem:[#allocation9 + $0x70] sm:$0xff]  ;;  %v489_v33 = vsub.s32 0, %v488_v27 }
  0x96   :  { %v370_v2 = vmul.f32 %v354_v45, %v338_v55  ;;  %v324_v61 = vsel %vm1128_vm15, %v321_v25, %v318_v58  ;;  %v339_v62 = vsel %vm147_vm13, %v1042_v60, %v315_v59  ;;  %v467_v60 = vld [vmem:[%s1172_s5] sm:$0x1] }
  0x97   :  { %v385_v49 = vadd.f32 %v369_v56, %v97_v26  ;;  %v340_v4 = vsel %vm148_vm0, %v1046_v63, %v324_v61  ;;  %v371_v5 = vmul.f32 %v355_v51, %v339_v62  ;;  %v468_v16 = vmin.f32 %v467_v60, 20.0 }
  0x98   :  { %v386_v1 = vadd.f32 %v370_v2, %v98_v48  ;;  %v372_v7 = vmul.f32 %v356_v3, %v340_v4  ;;  %vm469_vm2 = vcmp.gt.f32.partialorder %v467_v60, 20.0 }
  0x99   :  { %580 = vmatpush3.bf16.xpose.msra.mxu0 %v579_v43  ;;  %v387_v47 = vadd.f32 %v371_v5, %v99_v10  ;;  %v470_v63 = vmul.f32 1.442695, %v468_v16 }
  0x9a   :  { %581 = vmatprep.subr.bf16.mxu0 %v789_v0  ;;  %v582_v9 = vpack.c.bf16 %v386_v1, %v385_v49  ;;  %v388_v12 = vadd.f32 %v372_v7, %v100_v11 }
  0x9b   :  { %661 = vpow2.f32 %v470_v63 }
  0x9c   :  { %v585_v15 = vpack.c.bf16 %v388_v12, %v387_v47 }
  0xa1   :  { %583 = vmatpush3.bf16.xpose.msra.mxu0 %v582_v9 }
  0xa2   :  { %584 = vmatprep.subr.bf16.mxu0 %v789_v0 }
  0xa5   :  { %v662_v17 = vpop.eup %661 }
  0xa6   :  { %v472_v18 = vadd.f32 1.0, %v662_v17  ;;  %v475_v19 = vmul.f32 -0.5, %v662_v17  ;;  %v478_v22 = vand.u32 2147483647, %v662_v17 }
  0xa8   :  { %663 = vlog2.f32 %v472_v18  ;;  %v476_v21 = vadd.f32 1.0, %v475_v19  ;;  %vm479_vm1 = vcmp.lt.f32.partialorder %v478_v22, 0.0004427343 }
  0xa9   :  { %586 = vmatpush3.bf16.xpose.msra.mxu0 %v585_v15 }
  0xaa   :  { %v477_v0 = vmul.f32 %v662_v17, %v476_v21 }
  0xb0   :  { %561 = vmatmul.mubr.f32.vlgmr.msra.gmra.mrb[0].mxu0 %v390_v29 }
  0xb2   :  { %v664_v20 = vpop.eup %663 }
  0xb3   :  { %v474_v23 = vmul.f32 0.6931472, %v664_v20 }
  0xb5   :  { %v480_v8 = vsel %vm479_vm1, %v477_v0, %v474_v23 }
  0xb6   :  { %v481_v24 = vsel %vm469_vm2, %v467_v60, %v480_v8 }
  0xb7   :  { %v483_v30 = vmul.f32 %v482_v28, %v481_v24 }
  0xb9   :  { %v484_v32 = vadd.f32 %v483_v30, %v466_v31 }
  0xbb   :  { %v490_v34 = vrot.slane %v484_v32, %v489_v33 }
 0x183   :  { %v457_v36 = vpop.f32.mrb[0].mxu0 }
 0x184   :  { %v492_v50 = vadd.f32 %v490_v34, %v457_v36  ;;  %v562_v37 = vpop.f32.mrb[1].mxu0 }
 0x186   :  { %493 = vst [vmem:[#allocation11] sm:$0xff] %v492_v50 }
 0x187   :  { %764 = shalt.err (!%p761_p8)
}
 0x188   :  { %s765_s4 = scalar_lea.hbm %s1174_s7, 128 }
 0x189   :  { %p766_p9 = scmp.ne.s32.totalorder %s1174_s7, %s765_s4  ;;  %p769_p10 = scmp.lt.u32.totalorder %s765_s4, %s1174_s7 }
 0x18b   :  { %p771_p11 = pnand %p769_p10, %p766_p9 }
 0x18d   :  { %774 = shalt.err (!%p771_p11)
}
 0x18e   :  { %503 = dma.vmem_to_hbm [thread:$0]  %s501_s29, 128, %s1174_s7, [#allocation5]  }
 0x18f   :  { %781 = dma.done.wait [#allocation5], 128  }
 0x190   :  { %782 = vsyncadd [#allocation5], 4294967168 }
 0x191   :  { %507 = vsyncpa [#allocation4], 1 }
 0x192   :  { %508 = vsyncpa [#allocation7], 1 }
 0x193   :  { %509 = vsyncpa [#allocation10], 1 }
 0x194   :  { %510 = vsyncpa [#allocation5], 1 }

</bundles_post_ra>
